<compile_context>
chip_gen: v7x
topology: tpu7x:2x2x1
jax: 0.10.0
libtpu: 0.0.40
codegen_flags: <defaults>
</compile_context>

<pallas_src>
import functools

import numpy as np
import jax
import jax.numpy as jnp
from jax.experimental import pallas as pl
from jax.experimental.pallas import tpu as pltpu


def _eeb_kernel(x_ref, w1_ref, b1_ref, w2_ref, b2_ref, w3_ref, b3_ref,
                w4_ref, b4_ref, o_ref, patches_ref, *, W, apply_relu):
    Cin, S = x_ref.shape
    H = S // W
    Cmid = w1_ref.shape[0]
    mm_dtype = w1_ref.dtype            # matmul-operand dtype (f32 or bf16)

    # ---- Boundary masks, hoisted: computed once, reused by both 3x3 convs.
    lane = jax.lax.broadcasted_iota(jnp.int32, (1, S), 1)
    if W & (W - 1) == 0:               # power-of-two fast path
        wpos = lane & (W - 1)
        hpos = lane >> (W - 1).bit_length()
    else:
        wpos = lane % W
        hpos = lane // W
    dx_masks = [wpos >= 1, None, wpos <= W - 2]       # dx = 0, 1, 2
    dy_masks = [hpos >= 1, None, hpos <= H - 2]       # dy = 0, 1, 2

    tap_shifts, tap_masks = [], []
    for dy in range(3):
        for dx in range(3):
            m = dy_masks[dy]
            mx = dx_masks[dx]
            if mx is not None:
                m = mx if m is None else jnp.logical_and(m, mx)
            tap_masks.append(m)
            d = (dy - 1) * W + (dx - 1)     # tap[j] = act[j + d]
            tap_shifts.append((-d) % S)     # jnp.roll-style shift amount

    def conv3x3(act, w_ref, b_ref):
        # Build the 9 shifted / masked windows with XLU lane rotations and
        # stream each straight into the VMEM `patches` scratch, then do one
        # K = 9*Cmid matmul on the MXU (f32 accumulate).
        for t in range(9):
            win = act if tap_shifts[t] == 0 else pltpu.roll(act, tap_shifts[t], 1)
            if tap_masks[t] is not None:
                win = jnp.where(tap_masks[t], win, 0.0)
            patches_ref[t * Cmid:(t + 1) * Cmid, :] = win.astype(mm_dtype)
        return (jnp.dot(w_ref[...], patches_ref[...],
                        preferred_element_type=jnp.float32) + b_ref[...])

    # conv1 (1x1): (Cmid, Cin) @ (Cin, S).
    x1 = (jnp.dot(w1_ref[...], x_ref[...].astype(mm_dtype),
                  preferred_element_type=jnp.float32) + b1_ref[...])

    # BatchNorm (inference mode) pre-folded into w2/b2, w3/b3, w4/b4.
    r = jnp.maximum(conv3x3(x1, w2_ref, b2_ref), 0.0)
    r = jnp.maximum(conv3x3(r, w3_ref, b3_ref), 0.0)

    # conv4 (1x1) on the residual sum, bn2 folded, optional final ReLU.
    y = (jnp.dot(w4_ref[...], (x1 + r).astype(mm_dtype),
                 preferred_element_type=jnp.float32) + b4_ref[...])
    if apply_relu:
        y = jnp.maximum(y, 0.0)
    o_ref[...] = y.astype(o_ref.dtype)


def fold_bn(gamma, beta, mean, var, eps=1e-5):
    s = gamma / jnp.sqrt(var + eps)
    return s, beta - mean * s


def prepare_params(torch_params, eps=1e-5):
    """Fold inference-mode BatchNorm into the conv weights and lay the weights
    out for channel-major (C, H*W) matmuls. Pure host-side preprocessing."""
    (c1w, c1b, c2w, c2b, c3w, c3b, c4w, c4b,
     g, bt, mu, var, g2, bt2, mu2, var2) = torch_params
    Cmid, Cin = c1w.shape[0], c1w.shape[1]
    Cout = c4w.shape[0]

    bn_s, bn_b = fold_bn(g, bt, mu, var, eps)
    bn2_s, bn2_b = fold_bn(g2, bt2, mu2, var2, eps)

    def mat3x3(w_oihw):   # (O, I, 3, 3) -> (O, 9*I); columns ordered (ky, kx, i)
        return jnp.transpose(w_oihw, (0, 2, 3, 1)).reshape(w_oihw.shape[0], -1)

    w1 = c1w.reshape(Cmid, Cin)
    b1 = c1b.reshape(Cmid, 1)
    w2 = mat3x3(c2w) * bn_s[:, None]
    b2 = (c2b * bn_s + bn_b).reshape(Cmid, 1)
    w3 = mat3x3(c3w) * bn_s[:, None]
    b3 = (c3b * bn_s + bn_b).reshape(Cmid, 1)
    w4 = c4w.reshape(Cout, Cmid) * bn2_s[:, None]
    b4 = (c4b * bn2_s + bn2_b).reshape(Cout, 1)
    return (w1, b1, w2, b2, w3, b3, w4, b4)


def eeb_forward(x_nchw, kernel_params, relu=True, mm_dtype=jnp.float32):
    (w1, b1, w2, b2, w3, b3, w4, b4) = kernel_params
    B, Cin, H, W = x_nchw.shape
    S = H * W
    Cmid = w1.shape[0]
    Cout = w4.shape[0]
    assert S % 128 == 0, "H*W must be a multiple of 128 for lane-dense stores"
    # TODO(synk): pad H*W up to a lane multiple in the wrapper for other sizes.

    # NCHW flattened IS the (B, C, H*W) channel-major layout the kernel wants.
    x_flat = x_nchw.reshape(B, Cin, S).astype(jnp.float32)
    # Matmul operands in mm_dtype (bf16 on v6e/v7x); biases/elementwise stay f32.
    w1, w2, w3, w4 = (w.astype(mm_dtype) for w in (w1, w2, w3, w4))

    kernel = functools.partial(_eeb_kernel, W=W, apply_relu=relu)

    def full(shape):
        return pl.BlockSpec(shape, lambda b: (0,) * len(shape))

    flops = 2 * B * S * (Cmid * Cin + 2 * 9 * Cmid * Cmid + Cout * Cmid)
    bytes_accessed = int(
        x_flat.size * 4 + B * Cout * S * 4
        + sum(int(a.size) * a.dtype.itemsize
              for a in (w1, b1, w2, b2, w3, b3, w4, b4)))

    out = pl.pallas_call(
        kernel,
        out_shape=jax.ShapeDtypeStruct((B, Cout, S), jnp.float32),
        grid=(B,),
        in_specs=[
            pl.BlockSpec((pl.Squeezed(), Cin, S), lambda b: (b, 0, 0)),
            full(w1.shape), full(b1.shape),
            full(w2.shape), full(b2.shape),
            full(w3.shape), full(b3.shape),
            full(w4.shape), full(b4.shape),
        ],
        out_specs=pl.BlockSpec((pl.Squeezed(), Cout, S), lambda b: (b, 0, 0)),
        scratch_shapes=[pltpu.VMEM((9 * Cmid, S), mm_dtype)],
        compiler_params=pltpu.CompilerParams(
            dimension_semantics=("parallel",)),
        cost_estimate=pl.CostEstimate(flops=flops, transcendentals=0,
                                      bytes_accessed=bytes_accessed),
    )(x_flat, w1, b1, w2, b2, w3, b3, w4, b4)

    return out.reshape(B, Cout, H, W)


def _ref_forward(x, torch_params, relu=True, eps=1e-5):
    """Pure-JAX reference (lax conv, PyTorch OIHW layout) for correctness."""
    (c1w, c1b, c2w, c2b, c3w, c3b, c4w, c4b,
     g, bt, mu, var, g2, bt2, mu2, var2) = torch_params
    dn = ('NCHW', 'OIHW', 'NCHW')

    def conv(z, w, b, pad):
        y = jax.lax.conv_general_dilated(z, w, (1, 1), ((pad, pad), (pad, pad)),
                                         dimension_numbers=dn)
        return y + b.reshape(1, -1, 1, 1)

    def bn(z, gamma, beta, mean, var_):
        c = lambda a: a.reshape(1, -1, 1, 1)
        return (z - c(mean)) * (c(gamma) / jnp.sqrt(c(var_) + eps)) + c(beta)

    x1 = conv(x, c1w, c1b, 0)
    r = jax.nn.relu(bn(conv(x1, c2w, c2b, 1), g, bt, mu, var))
    r = jax.nn.relu(bn(conv(r, c3w, c3b, 1), g, bt, mu, var))
    y = bn(conv(x1 + r, c4w, c4b, 0), g2, bt2, mu2, var2)
    return jax.nn.relu(y) if relu else y


if __name__ == "__main__":
    B, Cin, H, W = 2, 32, 16, 16
    inter_scale = 4
    Cmid = Cin // inter_scale     # 8
    Cout = 16

    key = jax.random.PRNGKey(0)
    keys = jax.random.split(key, 17)
    nrm = lambda k, shape, s=0.1: jax.random.normal(k, shape, jnp.float32) * s

    # Conv params in PyTorch OIHW layout.
    c1w = nrm(keys[0], (Cmid, Cin, 1, 1));  c1b = nrm(keys[1], (Cmid,))
    c2w = nrm(keys[2], (Cmid, Cmid, 3, 3)); c2b = nrm(keys[3], (Cmid,))
    c3w = nrm(keys[4], (Cmid, Cmid, 3, 3)); c3b = nrm(keys[5], (Cmid,))
    c4w = nrm(keys[6], (Cout, Cmid, 1, 1)); c4b = nrm(keys[7], (Cout,))

    # BatchNorm running stats (inference mode).
    # TODO(synk): training-mode BN (batch statistics) is not reproduced here.
    g    = 1.0 + 0.1 * jax.random.normal(keys[8], (Cmid,), jnp.float32)
    bt   = 0.1 * jax.random.normal(keys[9], (Cmid,), jnp.float32)
    mu   = 0.1 * jax.random.normal(keys[10], (Cmid,), jnp.float32)
    var  = jnp.abs(jax.random.normal(keys[11], (Cmid,), jnp.float32)) + 0.5
    g2   = 1.0 + 0.1 * jax.random.normal(keys[12], (Cout,), jnp.float32)
    bt2  = 0.1 * jax.random.normal(keys[13], (Cout,), jnp.float32)
    mu2  = 0.1 * jax.random.normal(keys[14], (Cout,), jnp.float32)
    var2 = jnp.abs(jax.random.normal(keys[15], (Cout,), jnp.float32)) + 0.5

    torch_params = (c1w, c1b, c2w, c2b, c3w, c3b, c4w, c4b,
                    g, bt, mu, var, g2, bt2, mu2, var2)
    kernel_params = prepare_params(torch_params)

    x = jax.random.normal(keys[16], (B, Cin, H, W), jnp.float32)
    ref = _ref_forward(x, torch_params, relu=True)

    # f32 matmul-operand path: exact parity with the reference.
    out_f32 = jax.block_until_ready(
        eeb_forward(x, kernel_params, relu=True, mm_dtype=jnp.float32))
    np.testing.assert_allclose(np.asarray(out_f32), np.asarray(ref),
                               rtol=1e-4, atol=1e-4)

    # bf16 matmul-operand path (v6e/v7x MXU-native, f32 accumulate).
    out_bf16 = jax.block_until_ready(
        eeb_forward(x, kernel_params, relu=True, mm_dtype=jnp.bfloat16))
    np.testing.assert_allclose(np.asarray(out_bf16), np.asarray(ref),
                               rtol=3e-2, atol=3e-2)

    print("KERNEL_OK")
</pallas_src>

<mosaic_0001>
module attributes {stable_mosaic.version = 11 : i64} {
  func.func @_eeb_kernel(%arg0: i32, %arg1: memref<1x32x256xf32, #tpu.memory_space<vmem>>, %arg2: memref<8x32xf32, #tpu.memory_space<vmem>>, %arg3: memref<8x1xf32, #tpu.memory_space<vmem>>, %arg4: memref<8x72xf32, #tpu.memory_space<vmem>>, %arg5: memref<8x1xf32, #tpu.memory_space<vmem>>, %arg6: memref<8x72xf32, #tpu.memory_space<vmem>>, %arg7: memref<8x1xf32, #tpu.memory_space<vmem>>, %arg8: memref<16x8xf32, #tpu.memory_space<vmem>>, %arg9: memref<16x1xf32, #tpu.memory_space<vmem>>, %arg10: memref<1x16x256xf32, #tpu.memory_space<vmem>>, %arg11: memref<72x256xf32, #tpu.memory_space<vmem>>) attributes {dimension_semantics = [#tpu.dimension_semantics<parallel>], iteration_bounds = array<i64: 2>, scalar_prefetch = 0 : i64, scratch_operands = 1 : i64, tpu.core_type = #tpu.core_type<tc>, window_params = [{transform_indices = @transform_0, window_bounds = array<i64: 1, 32, 256>}, {pipeline_mode = #tpu.pipeline_mode<synchronous>, transform_indices = @transform_1, window_bounds = array<i64: 8, 32>}, {pipeline_mode = #tpu.pipeline_mode<synchronous>, transform_indices = @transform_2, window_bounds = array<i64: 8, 1>}, {pipeline_mode = #tpu.pipeline_mode<synchronous>, transform_indices = @transform_3, window_bounds = array<i64: 8, 72>}, {pipeline_mode = #tpu.pipeline_mode<synchronous>, transform_indices = @transform_4, window_bounds = array<i64: 8, 1>}, {pipeline_mode = #tpu.pipeline_mode<synchronous>, transform_indices = @transform_5, window_bounds = array<i64: 8, 72>}, {pipeline_mode = #tpu.pipeline_mode<synchronous>, transform_indices = @transform_6, window_bounds = array<i64: 8, 1>}, {pipeline_mode = #tpu.pipeline_mode<synchronous>, transform_indices = @transform_7, window_bounds = array<i64: 16, 8>}, {pipeline_mode = #tpu.pipeline_mode<synchronous>, transform_indices = @transform_8, window_bounds = array<i64: 16, 1>}, {transform_indices = @transform_9, window_bounds = array<i64: 1, 16, 256>}]} {
    %0 = tpu.iota {dimensions = array<i32: 1>} : vector<1x256xi32>
    %c15_i32 = arith.constant 15 : i32
    %1 = vector.broadcast %c15_i32 : i32 to vector<1x256xi32>
    %2 = arith.andi %0, %1 : vector<1x256xi32>
    %c4_i32 = arith.constant 4 : i32
    %3 = vector.broadcast %c4_i32 : i32 to vector<1x256xi32>
    %4 = arith.shrsi %0, %3 : vector<1x256xi32>
    %c1_i32 = arith.constant 1 : i32
    %5 = vector.broadcast %c1_i32 : i32 to vector<1x256xi32>
    %6 = arith.cmpi sge, %2, %5 : vector<1x256xi32>
    %c14_i32 = arith.constant 14 : i32
    %7 = vector.broadcast %c14_i32 : i32 to vector<1x256xi32>
    %8 = arith.cmpi sle, %2, %7 : vector<1x256xi32>
    %c1_i32_0 = arith.constant 1 : i32
    %9 = vector.broadcast %c1_i32_0 : i32 to vector<1x256xi32>
    %10 = arith.cmpi sge, %4, %9 : vector<1x256xi32>
    %c14_i32_1 = arith.constant 14 : i32
    %11 = vector.broadcast %c14_i32_1 : i32 to vector<1x256xi32>
    %12 = arith.cmpi sle, %4, %11 : vector<1x256xi32>
    %13 = arith.andi %10, %6 : vector<1x256xi1>
    %14 = arith.andi %10, %8 : vector<1x256xi1>
    %15 = arith.andi %12, %6 : vector<1x256xi1>
    %16 = arith.andi %12, %8 : vector<1x256xi1>
    %c0 = arith.constant 0 : index
    %c0_2 = arith.constant 0 : index
    %17 = vector.load %arg2[%c0, %c0_2] : memref<8x32xf32, #tpu.memory_space<vmem>>, vector<8x32xf32>
    %c0_3 = arith.constant 0 : index
    %c0_4 = arith.constant 0 : index
    %c0_5 = arith.constant 0 : index
    %18 = vector.load %arg1[%c0_3, %c0_4, %c0_5] : memref<1x32x256xf32, #tpu.memory_space<vmem>>, vector<1x32x256xf32>
    %19 = vector.shape_cast %18 : vector<1x32x256xf32> to vector<32x256xf32>
    %cst = arith.constant dense<0.000000e+00> : vector<8x256xf32>
    %20 = tpu.matmul %17, %19, %cst {dimension_numbers = #tpu.dot_dimension_numbers<[1], [0], [0], [1], [0, 0, 1, 1], [], []>} : vector<8x32xf32>, vector<32x256xf32>, vector<8x256xf32> -> vector<8x256xf32>
    %c0_6 = arith.constant 0 : index
    %c0_7 = arith.constant 0 : index
    %21 = vector.load %arg3[%c0_6, %c0_7] : memref<8x1xf32, #tpu.memory_space<vmem>>, vector<8x1xf32>
    %22 = vector.broadcast %21 : vector<8x1xf32> to vector<8x256xf32>
    %23 = arith.addf %20, %22 : vector<8x256xf32>
    %c17_i32 = arith.constant 17 : i32
    %24 = tpu.dynamic_rotate %23 by %c17_i32 dim 1 : vector<8x256xf32>, i32 -> vector<8x256xf32>
    %cst_8 = arith.constant 0.000000e+00 : f32
    %25 = vector.shape_cast %13 : vector<1x256xi1> to vector<1x256xi1>
    %26 = vector.broadcast %25 : vector<1x256xi1> to vector<8x256xi1>
    %27 = vector.broadcast %cst_8 : f32 to vector<8x256xf32>
    %28 = arith.select %26, %24, %27 : vector<8x256xi1>, vector<8x256xf32>
    %c0_9 = arith.constant 0 : index
    %c0_10 = arith.constant 0 : index
    %29 = vector.load %arg11[%c0_9, %c0_10] : memref<72x256xf32, #tpu.memory_space<vmem>>, vector<8x256xf32>
    tpu.vector_store %arg11[%c0_9, %c0_10], %28 {strides = array<i32>} : memref<72x256xf32, #tpu.memory_space<vmem>>, vector<8x256xf32>,
    %c16_i32 = arith.constant 16 : i32
    %30 = tpu.dynamic_rotate %23 by %c16_i32 dim 1 : vector<8x256xf32>, i32 -> vector<8x256xf32>
    %cst_11 = arith.constant 0.000000e+00 : f32
    %31 = vector.shape_cast %10 : vector<1x256xi1> to vector<1x256xi1>
    %32 = vector.broadcast %31 : vector<1x256xi1> to vector<8x256xi1>
    %33 = vector.broadcast %cst_11 : f32 to vector<8x256xf32>
    %34 = arith.select %32, %30, %33 : vector<8x256xi1>, vector<8x256xf32>
    %c8 = arith.constant 8 : index
    %c0_12 = arith.constant 0 : index
    %35 = vector.load %arg11[%c8, %c0_12] : memref<72x256xf32, #tpu.memory_space<vmem>>, vector<8x256xf32>
    tpu.vector_store %arg11[%c8, %c0_12], %34 {strides = array<i32>} : memref<72x256xf32, #tpu.memory_space<vmem>>, vector<8x256xf32>,
    %c15_i32_13 = arith.constant 15 : i32
    %36 = tpu.dynamic_rotate %23 by %c15_i32_13 dim 1 : vector<8x256xf32>, i32 -> vector<8x256xf32>
    %cst_14 = arith.constant 0.000000e+00 : f32
    %37 = vector.shape_cast %14 : vector<1x256xi1> to vector<1x256xi1>
    %38 = vector.broadcast %37 : vector<1x256xi1> to vector<8x256xi1>
    %39 = vector.broadcast %cst_14 : f32 to vector<8x256xf32>
    %40 = arith.select %38, %36, %39 : vector<8x256xi1>, vector<8x256xf32>
    %c16 = arith.constant 16 : index
    %c0_15 = arith.constant 0 : index
    %41 = vector.load %arg11[%c16, %c0_15] : memref<72x256xf32, #tpu.memory_space<vmem>>, vector<8x256xf32>
    tpu.vector_store %arg11[%c16, %c0_15], %40 {strides = array<i32>} : memref<72x256xf32, #tpu.memory_space<vmem>>, vector<8x256xf32>,
    %c1_i32_16 = arith.constant 1 : i32
    %42 = tpu.dynamic_rotate %23 by %c1_i32_16 dim 1 : vector<8x256xf32>, i32 -> vector<8x256xf32>
    %cst_17 = arith.constant 0.000000e+00 : f32
    %43 = vector.shape_cast %6 : vector<1x256xi1> to vector<1x256xi1>
    %44 = vector.broadcast %43 : vector<1x256xi1> to vector<8x256xi1>
    %45 = vector.broadcast %cst_17 : f32 to vector<8x256xf32>
    %46 = arith.select %44, %42, %45 : vector<8x256xi1>, vector<8x256xf32>
    %c24 = arith.constant 24 : index
    %c0_18 = arith.constant 0 : index
    %47 = vector.load %arg11[%c24, %c0_18] : memref<72x256xf32, #tpu.memory_space<vmem>>, vector<8x256xf32>
    tpu.vector_store %arg11[%c24, %c0_18], %46 {strides = array<i32>} : memref<72x256xf32, #tpu.memory_space<vmem>>, vector<8x256xf32>,
    %c32 = arith.constant 32 : index
    %c0_19 = arith.constant 0 : index
    %48 = vector.load %arg11[%c32, %c0_19] : memref<72x256xf32, #tpu.memory_space<vmem>>, vector<8x256xf32>
    tpu.vector_store %arg11[%c32, %c0_19], %23 {strides = array<i32>} : memref<72x256xf32, #tpu.memory_space<vmem>>, vector<8x256xf32>,
    %c255_i32 = arith.constant 255 : i32
    %49 = tpu.dynamic_rotate %23 by %c255_i32 dim 1 : vector<8x256xf32>, i32 -> vector<8x256xf32>
    %cst_20 = arith.constant 0.000000e+00 : f32
    %50 = vector.shape_cast %8 : vector<1x256xi1> to vector<1x256xi1>
    %51 = vector.broadcast %50 : vector<1x256xi1> to vector<8x256xi1>
    %52 = vector.broadcast %cst_20 : f32 to vector<8x256xf32>
    %53 = arith.select %51, %49, %52 : vector<8x256xi1>, vector<8x256xf32>
    %c40 = arith.constant 40 : index
    %c0_21 = arith.constant 0 : index
    %54 = vector.load %arg11[%c40, %c0_21] : memref<72x256xf32, #tpu.memory_space<vmem>>, vector<8x256xf32>
    tpu.vector_store %arg11[%c40, %c0_21], %53 {strides = array<i32>} : memref<72x256xf32, #tpu.memory_space<vmem>>, vector<8x256xf32>,
    %c241_i32 = arith.constant 241 : i32
    %55 = tpu.dynamic_rotate %23 by %c241_i32 dim 1 : vector<8x256xf32>, i32 -> vector<8x256xf32>
    %cst_22 = arith.constant 0.000000e+00 : f32
    %56 = vector.shape_cast %15 : vector<1x256xi1> to vector<1x256xi1>
    %57 = vector.broadcast %56 : vector<1x256xi1> to vector<8x256xi1>
    %58 = vector.broadcast %cst_22 : f32 to vector<8x256xf32>
    %59 = arith.select %57, %55, %58 : vector<8x256xi1>, vector<8x256xf32>
    %c48 = arith.constant 48 : index
    %c0_23 = arith.constant 0 : index
    %60 = vector.load %arg11[%c48, %c0_23] : memref<72x256xf32, #tpu.memory_space<vmem>>, vector<8x256xf32>
    tpu.vector_store %arg11[%c48, %c0_23], %59 {strides = array<i32>} : memref<72x256xf32, #tpu.memory_space<vmem>>, vector<8x256xf32>,
    %c240_i32 = arith.constant 240 : i32
    %61 = tpu.dynamic_rotate %23 by %c240_i32 dim 1 : vector<8x256xf32>, i32 -> vector<8x256xf32>
    %cst_24 = arith.constant 0.000000e+00 : f32
    %62 = vector.shape_cast %12 : vector<1x256xi1> to vector<1x256xi1>
    %63 = vector.broadcast %62 : vector<1x256xi1> to vector<8x256xi1>
    %64 = vector.broadcast %cst_24 : f32 to vector<8x256xf32>
    %65 = arith.select %63, %61, %64 : vector<8x256xi1>, vector<8x256xf32>
    %c56 = arith.constant 56 : index
    %c0_25 = arith.constant 0 : index
    %66 = vector.load %arg11[%c56, %c0_25] : memref<72x256xf32, #tpu.memory_space<vmem>>, vector<8x256xf32>
    tpu.vector_store %arg11[%c56, %c0_25], %65 {strides = array<i32>} : memref<72x256xf32, #tpu.memory_space<vmem>>, vector<8x256xf32>,
    %c239_i32 = arith.constant 239 : i32
    %67 = tpu.dynamic_rotate %23 by %c239_i32 dim 1 : vector<8x256xf32>, i32 -> vector<8x256xf32>
    %cst_26 = arith.constant 0.000000e+00 : f32
    %68 = vector.shape_cast %16 : vector<1x256xi1> to vector<1x256xi1>
    %69 = vector.broadcast %68 : vector<1x256xi1> to vector<8x256xi1>
    %70 = vector.broadcast %cst_26 : f32 to vector<8x256xf32>
    %71 = arith.select %69, %67, %70 : vector<8x256xi1>, vector<8x256xf32>
    %c64 = arith.constant 64 : index
    %c0_27 = arith.constant 0 : index
    %72 = vector.load %arg11[%c64, %c0_27] : memref<72x256xf32, #tpu.memory_space<vmem>>, vector<8x256xf32>
    tpu.vector_store %arg11[%c64, %c0_27], %71 {strides = array<i32>} : memref<72x256xf32, #tpu.memory_space<vmem>>, vector<8x256xf32>,
    %c0_28 = arith.constant 0 : index
    %c0_29 = arith.constant 0 : index
    %73 = vector.load %arg4[%c0_28, %c0_29] : memref<8x72xf32, #tpu.memory_space<vmem>>, vector<8x72xf32>
    %c0_30 = arith.constant 0 : index
    %c0_31 = arith.constant 0 : index
    %74 = vector.load %arg11[%c0_30, %c0_31] : memref<72x256xf32, #tpu.memory_space<vmem>>, vector<72x256xf32>
    %cst_32 = arith.constant dense<0.000000e+00> : vector<8x256xf32>
    %75 = tpu.matmul %73, %74, %cst_32 {dimension_numbers = #tpu.dot_dimension_numbers<[1], [0], [0], [1], [0, 0, 1, 1], [], []>} : vector<8x72xf32>, vector<72x256xf32>, vector<8x256xf32> -> vector<8x256xf32>
    %c0_33 = arith.constant 0 : index
    %c0_34 = arith.constant 0 : index
    %76 = vector.load %arg5[%c0_33, %c0_34] : memref<8x1xf32, #tpu.memory_space<vmem>>, vector<8x1xf32>
    %77 = vector.broadcast %76 : vector<8x1xf32> to vector<8x256xf32>
    %78 = arith.addf %75, %77 : vector<8x256xf32>
    %cst_35 = arith.constant 0.000000e+00 : f32
    %79 = vector.broadcast %cst_35 : f32 to vector<8x256xf32>
    %80 = arith.maximumf %78, %79 : vector<8x256xf32>
    %c17_i32_36 = arith.constant 17 : i32
    %81 = tpu.dynamic_rotate %80 by %c17_i32_36 dim 1 : vector<8x256xf32>, i32 -> vector<8x256xf32>
    %cst_37 = arith.constant 0.000000e+00 : f32
    %82 = vector.shape_cast %13 : vector<1x256xi1> to vector<1x256xi1>
    %83 = vector.broadcast %82 : vector<1x256xi1> to vector<8x256xi1>
    %84 = vector.broadcast %cst_37 : f32 to vector<8x256xf32>
    %85 = arith.select %83, %81, %84 : vector<8x256xi1>, vector<8x256xf32>
    %c0_38 = arith.constant 0 : index
    %c0_39 = arith.constant 0 : index
    %86 = vector.load %arg11[%c0_38, %c0_39] : memref<72x256xf32, #tpu.memory_space<vmem>>, vector<8x256xf32>
    tpu.vector_store %arg11[%c0_38, %c0_39], %85 {strides = array<i32>} : memref<72x256xf32, #tpu.memory_space<vmem>>, vector<8x256xf32>,
    %c16_i32_40 = arith.constant 16 : i32
    %87 = tpu.dynamic_rotate %80 by %c16_i32_40 dim 1 : vector<8x256xf32>, i32 -> vector<8x256xf32>
    %cst_41 = arith.constant 0.000000e+00 : f32
    %88 = vector.shape_cast %10 : vector<1x256xi1> to vector<1x256xi1>
    %89 = vector.broadcast %88 : vector<1x256xi1> to vector<8x256xi1>
    %90 = vector.broadcast %cst_41 : f32 to vector<8x256xf32>
    %91 = arith.select %89, %87, %90 : vector<8x256xi1>, vector<8x256xf32>
    %c8_42 = arith.constant 8 : index
    %c0_43 = arith.constant 0 : index
    %92 = vector.load %arg11[%c8_42, %c0_43] : memref<72x256xf32, #tpu.memory_space<vmem>>, vector<8x256xf32>
    tpu.vector_store %arg11[%c8_42, %c0_43], %91 {strides = array<i32>} : memref<72x256xf32, #tpu.memory_space<vmem>>, vector<8x256xf32>,
    %c15_i32_44 = arith.constant 15 : i32
    %93 = tpu.dynamic_rotate %80 by %c15_i32_44 dim 1 : vector<8x256xf32>, i32 -> vector<8x256xf32>
    %cst_45 = arith.constant 0.000000e+00 : f32
    %94 = vector.shape_cast %14 : vector<1x256xi1> to vector<1x256xi1>
    %95 = vector.broadcast %94 : vector<1x256xi1> to vector<8x256xi1>
    %96 = vector.broadcast %cst_45 : f32 to vector<8x256xf32>
    %97 = arith.select %95, %93, %96 : vector<8x256xi1>, vector<8x256xf32>
    %c16_46 = arith.constant 16 : index
    %c0_47 = arith.constant 0 : index
    %98 = vector.load %arg11[%c16_46, %c0_47] : memref<72x256xf32, #tpu.memory_space<vmem>>, vector<8x256xf32>
    tpu.vector_store %arg11[%c16_46, %c0_47], %97 {strides = array<i32>} : memref<72x256xf32, #tpu.memory_space<vmem>>, vector<8x256xf32>,
    %c1_i32_48 = arith.constant 1 : i32
    %99 = tpu.dynamic_rotate %80 by %c1_i32_48 dim 1 : vector<8x256xf32>, i32 -> vector<8x256xf32>
    %cst_49 = arith.constant 0.000000e+00 : f32
    %100 = vector.shape_cast %6 : vector<1x256xi1> to vector<1x256xi1>
    %101 = vector.broadcast %100 : vector<1x256xi1> to vector<8x256xi1>
    %102 = vector.broadcast %cst_49 : f32 to vector<8x256xf32>
    %103 = arith.select %101, %99, %102 : vector<8x256xi1>, vector<8x256xf32>
    %c24_50 = arith.constant 24 : index
    %c0_51 = arith.constant 0 : index
    %104 = vector.load %arg11[%c24_50, %c0_51] : memref<72x256xf32, #tpu.memory_space<vmem>>, vector<8x256xf32>
    tpu.vector_store %arg11[%c24_50, %c0_51], %103 {strides = array<i32>} : memref<72x256xf32, #tpu.memory_space<vmem>>, vector<8x256xf32>,
    %c32_52 = arith.constant 32 : index
    %c0_53 = arith.constant 0 : index
    %105 = vector.load %arg11[%c32_52, %c0_53] : memref<72x256xf32, #tpu.memory_space<vmem>>, vector<8x256xf32>
    tpu.vector_store %arg11[%c32_52, %c0_53], %80 {strides = array<i32>} : memref<72x256xf32, #tpu.memory_space<vmem>>, vector<8x256xf32>,
    %c255_i32_54 = arith.constant 255 : i32
    %106 = tpu.dynamic_rotate %80 by %c255_i32_54 dim 1 : vector<8x256xf32>, i32 -> vector<8x256xf32>
    %cst_55 = arith.constant 0.000000e+00 : f32
    %107 = vector.shape_cast %8 : vector<1x256xi1> to vector<1x256xi1>
    %108 = vector.broadcast %107 : vector<1x256xi1> to vector<8x256xi1>
    %109 = vector.broadcast %cst_55 : f32 to vector<8x256xf32>
    %110 = arith.select %108, %106, %109 : vector<8x256xi1>, vector<8x256xf32>
    %c40_56 = arith.constant 40 : index
    %c0_57 = arith.constant 0 : index
    %111 = vector.load %arg11[%c40_56, %c0_57] : memref<72x256xf32, #tpu.memory_space<vmem>>, vector<8x256xf32>
    tpu.vector_store %arg11[%c40_56, %c0_57], %110 {strides = array<i32>} : memref<72x256xf32, #tpu.memory_space<vmem>>, vector<8x256xf32>,
    %c241_i32_58 = arith.constant 241 : i32
    %112 = tpu.dynamic_rotate %80 by %c241_i32_58 dim 1 : vector<8x256xf32>, i32 -> vector<8x256xf32>
    %cst_59 = arith.constant 0.000000e+00 : f32
    %113 = vector.shape_cast %15 : vector<1x256xi1> to vector<1x256xi1>
    %114 = vector.broadcast %113 : vector<1x256xi1> to vector<8x256xi1>
    %115 = vector.broadcast %cst_59 : f32 to vector<8x256xf32>
    %116 = arith.select %114, %112, %115 : vector<8x256xi1>, vector<8x256xf32>
    %c48_60 = arith.constant 48 : index
    %c0_61 = arith.constant 0 : index
    %117 = vector.load %arg11[%c48_60, %c0_61] : memref<72x256xf32, #tpu.memory_space<vmem>>, vector<8x256xf32>
    tpu.vector_store %arg11[%c48_60, %c0_61], %116 {strides = array<i32>} : memref<72x256xf32, #tpu.memory_space<vmem>>, vector<8x256xf32>,
    %c240_i32_62 = arith.constant 240 : i32
    %118 = tpu.dynamic_rotate %80 by %c240_i32_62 dim 1 : vector<8x256xf32>, i32 -> vector<8x256xf32>
    %cst_63 = arith.constant 0.000000e+00 : f32
    %119 = vector.shape_cast %12 : vector<1x256xi1> to vector<1x256xi1>
    %120 = vector.broadcast %119 : vector<1x256xi1> to vector<8x256xi1>
    %121 = vector.broadcast %cst_63 : f32 to vector<8x256xf32>
    %122 = arith.select %120, %118, %121 : vector<8x256xi1>, vector<8x256xf32>
    %c56_64 = arith.constant 56 : index
    %c0_65 = arith.constant 0 : index
    %123 = vector.load %arg11[%c56_64, %c0_65] : memref<72x256xf32, #tpu.memory_space<vmem>>, vector<8x256xf32>
    tpu.vector_store %arg11[%c56_64, %c0_65], %122 {strides = array<i32>} : memref<72x256xf32, #tpu.memory_space<vmem>>, vector<8x256xf32>,
    %c239_i32_66 = arith.constant 239 : i32
    %124 = tpu.dynamic_rotate %80 by %c239_i32_66 dim 1 : vector<8x256xf32>, i32 -> vector<8x256xf32>
    %cst_67 = arith.constant 0.000000e+00 : f32
    %125 = vector.shape_cast %16 : vector<1x256xi1> to vector<1x256xi1>
    %126 = vector.broadcast %125 : vector<1x256xi1> to vector<8x256xi1>
    %127 = vector.broadcast %cst_67 : f32 to vector<8x256xf32>
    %128 = arith.select %126, %124, %127 : vector<8x256xi1>, vector<8x256xf32>
    %c64_68 = arith.constant 64 : index
    %c0_69 = arith.constant 0 : index
    %129 = vector.load %arg11[%c64_68, %c0_69] : memref<72x256xf32, #tpu.memory_space<vmem>>, vector<8x256xf32>
    tpu.vector_store %arg11[%c64_68, %c0_69], %128 {strides = array<i32>} : memref<72x256xf32, #tpu.memory_space<vmem>>, vector<8x256xf32>,
    %c0_70 = arith.constant 0 : index
    %c0_71 = arith.constant 0 : index
    %130 = vector.load %arg6[%c0_70, %c0_71] : memref<8x72xf32, #tpu.memory_space<vmem>>, vector<8x72xf32>
    %c0_72 = arith.constant 0 : index
    %c0_73 = arith.constant 0 : index
    %131 = vector.load %arg11[%c0_72, %c0_73] : memref<72x256xf32, #tpu.memory_space<vmem>>, vector<72x256xf32>
    %cst_74 = arith.constant dense<0.000000e+00> : vector<8x256xf32>
    %132 = tpu.matmul %130, %131, %cst_74 {dimension_numbers = #tpu.dot_dimension_numbers<[1], [0], [0], [1], [0, 0, 1, 1], [], []>} : vector<8x72xf32>, vector<72x256xf32>, vector<8x256xf32> -> vector<8x256xf32>
    %c0_75 = arith.constant 0 : index
    %c0_76 = arith.constant 0 : index
    %133 = vector.load %arg7[%c0_75, %c0_76] : memref<8x1xf32, #tpu.memory_space<vmem>>, vector<8x1xf32>
    %134 = vector.broadcast %133 : vector<8x1xf32> to vector<8x256xf32>
    %135 = arith.addf %132, %134 : vector<8x256xf32>
    %cst_77 = arith.constant 0.000000e+00 : f32
    %136 = vector.broadcast %cst_77 : f32 to vector<8x256xf32>
    %137 = arith.maximumf %135, %136 : vector<8x256xf32>
    %c0_78 = arith.constant 0 : index
    %c0_79 = arith.constant 0 : index
    %138 = vector.load %arg8[%c0_78, %c0_79] : memref<16x8xf32, #tpu.memory_space<vmem>>, vector<16x8xf32>
    %139 = arith.addf %23, %137 : vector<8x256xf32>
    %cst_80 = arith.constant dense<0.000000e+00> : vector<16x256xf32>
    %140 = tpu.matmul %138, %139, %cst_80 {dimension_numbers = #tpu.dot_dimension_numbers<[1], [0], [0], [1], [0, 0, 1, 1], [], []>} : vector<16x8xf32>, vector<8x256xf32>, vector<16x256xf32> -> vector<16x256xf32>
    %c0_81 = arith.constant 0 : index
    %c0_82 = arith.constant 0 : index
    %141 = vector.load %arg9[%c0_81, %c0_82] : memref<16x1xf32, #tpu.memory_space<vmem>>, vector<16x1xf32>
    %142 = vector.broadcast %141 : vector<16x1xf32> to vector<16x256xf32>
    %143 = arith.addf %140, %142 : vector<16x256xf32>
    %cst_83 = arith.constant 0.000000e+00 : f32
    %144 = vector.broadcast %cst_83 : f32 to vector<16x256xf32>
    %145 = arith.maximumf %143, %144 : vector<16x256xf32>
    %c0_84 = arith.constant 0 : index
    %c0_85 = arith.constant 0 : index
    %c0_86 = arith.constant 0 : index
    %146 = vector.load %arg10[%c0_84, %c0_85, %c0_86] : memref<1x16x256xf32, #tpu.memory_space<vmem>>, vector<1x16x256xf32>
    %147 = vector.shape_cast %146 : vector<1x16x256xf32> to vector<16x256xf32>
    %148 = vector.shape_cast %145 : vector<16x256xf32> to vector<1x16x256xf32>
    tpu.vector_store %arg10[%c0_84, %c0_85, %c0_86], %148 {strides = array<i32>} : memref<1x16x256xf32, #tpu.memory_space<vmem>>, vector<1x16x256xf32>,
    return
  }
  func.func @transform_0(%arg0: i32) -> (i32, i32, i32) {
    %c0_i32 = arith.constant 0 : i32
    %c0_i32_0 = arith.constant 0 : i32
    %c0_i32_1 = arith.constant 0 : i32
    return %arg0, %c0_i32, %c0_i32_0 : i32, i32, i32
  }
  func.func @transform_1(%arg0: i32) -> (i32, i32) {
    %c0_i32 = arith.constant 0 : i32
    %c0_i32_0 = arith.constant 0 : i32
    %c0_i32_1 = arith.constant 0 : i32
    return %c0_i32, %c0_i32_0 : i32, i32
  }
  func.func @transform_2(%arg0: i32) -> (i32, i32) {
    %c0_i32 = arith.constant 0 : i32
    %c0_i32_0 = arith.constant 0 : i32
    %c0_i32_1 = arith.constant 0 : i32
    return %c0_i32, %c0_i32_0 : i32, i32
  }
  func.func @transform_3(%arg0: i32) -> (i32, i32) {
    %c0_i32 = arith.constant 0 : i32
    %c0_i32_0 = arith.constant 0 : i32
    %c0_i32_1 = arith.constant 0 : i32
    return %c0_i32, %c0_i32_0 : i32, i32
  }
  func.func @transform_4(%arg0: i32) -> (i32, i32) {
    %c0_i32 = arith.constant 0 : i32
    %c0_i32_0 = arith.constant 0 : i32
    %c0_i32_1 = arith.constant 0 : i32
    return %c0_i32, %c0_i32_0 : i32, i32
  }
  func.func @transform_5(%arg0: i32) -> (i32, i32) {
    %c0_i32 = arith.constant 0 : i32
    %c0_i32_0 = arith.constant 0 : i32
    %c0_i32_1 = arith.constant 0 : i32
    return %c0_i32, %c0_i32_0 : i32, i32
  }
  func.func @transform_6(%arg0: i32) -> (i32, i32) {
    %c0_i32 = arith.constant 0 : i32
    %c0_i32_0 = arith.constant 0 : i32
    %c0_i32_1 = arith.constant 0 : i32
    return %c0_i32, %c0_i32_0 : i32, i32
  }
  func.func @transform_7(%arg0: i32) -> (i32, i32) {
    %c0_i32 = arith.constant 0 : i32
    %c0_i32_0 = arith.constant 0 : i32
    %c0_i32_1 = arith.constant 0 : i32
    return %c0_i32, %c0_i32_0 : i32, i32
  }
  func.func @transform_8(%arg0: i32) -> (i32, i32) {
    %c0_i32 = arith.constant 0 : i32
    %c0_i32_0 = arith.constant 0 : i32
    %c0_i32_1 = arith.constant 0 : i32
    return %c0_i32, %c0_i32_0 : i32, i32
  }
  func.func @transform_9(%arg0: i32) -> (i32, i32, i32) {
    %c0_i32 = arith.constant 0 : i32
    %c0_i32_0 = arith.constant 0 : i32
    %c0_i32_1 = arith.constant 0 : i32
    return %arg0, %c0_i32, %c0_i32_0 : i32, i32, i32
  }
}

</mosaic_0001>

<bundles_post_ra>
// kernel: tpu_custom_call.1
= control target key start
LH: loop header
LB: loop body
LE: loop exit
PB: predicated region body
PF: predicated region fallthrough
CT: control target
= control target key end

     0   :  { %14 = vsyncpa [#allocation4], 0  ;;  %s1948_s0 = inlined_call_operand.hbm [shape: f32[2,32,256], index: 0, kind: input, shape index: {}]   ;;  %s1949_s1 = inlined_call_operand.vmem [shape: f32[8,32], index: 1, kind: input, shape index: {}]   ;;  %s1950_s2 = inlined_call_operand.vmem [shape: f32[8,1], index: 2, kind: input, shape index: {}]   ;;  %s1951_s3 = inlined_call_operand.vmem [shape: f32[8,72], index: 3, kind: input, shape index: {}]   ;;  %s1952_s4 = inlined_call_operand.vmem [shape: f32[8,1], index: 4, kind: input, shape index: {}]   ;;  %s1953_s5 = inlined_call_operand.vmem [shape: f32[8,72], index: 5, kind: input, shape index: {}]   ;;  %s1954_s6 = inlined_call_operand.vmem [shape: f32[8,1], index: 6, kind: input, shape index: {}]   ;;  %s1955_s7 = inlined_call_operand.vmem [shape: f32[16,8], index: 7, kind: input, shape index: {}]   ;;  %s1956_s8 = inlined_call_operand.vmem [shape: f32[16,1], index: 8, kind: input, shape index: {}]   ;;  %s1957_s9 = inlined_call_operand.hbm [shape: f32[2,16,256], index: 9, kind: output, shape index: {}]  }
   0x1   :  { %16 = vsyncpa [#allocation4 + $0x1], 0 }
   0x2   :  { %17 = vsyncpa [#allocation5], 0 }
   0x3   :  { %19 = vsyncpa [#allocation5 + $0x1], 0  ;;  %s1471_s30 = smov 0   ;;  %s1473_s10 = smov 0  }
   0x4   :  { %s1475_s11 = smov 0   ;;  %s1477_s12 = smov 0  }
   0x5 LB: > { %s1492_s13 = sadd.s32 4294967295, %s1403_s12   ;;  %s1066_s14 = sadd.s32 4294967294, %s1403_s12   ;;  %s1403_s12 = sphi %s1477_s12, %s2032_s12   ;;  %s1399_s11 = sphi %s1475_s11, %s2031_s11   ;;  %s1395_s10 = sphi %s1473_s10, %s2030_s10   ;;  %s1391_s30 = sphi %s1471_s30, %s2029_s30  }
   0x6   : > { %s1496_s15 = sadd.s32 1, %s1403_s12   ;;  %s32_s16 = sadd.s32 1, %s1399_s11 }
   0x7   : > { %s29_s17 = ssub.s32 %s1403_s12, %s1496_s15  ;;  %p39_p0 = scmp.ne.s32.totalorder %s1399_s11, %s1395_s10 }
   0x8   : > { %p30_p1 = scmp.eq.s32.totalorder %s29_s17, 0  ;;  %p40_p2 = scmp.eq.s32.totalorder %s1403_s12, 0 }
   0x9   : > { %p45_p3 = scmp.ne.s32.totalorder %s1395_s10, %s1391_s30  ;;  %p46_p4 = scmp.eq.s32.totalorder %s1492_s13, 0 }
   0xa   : > { %s1508_s18 = scalar_select %p30_p1, %s1399_s11, %s32_s16  }
   0xb   : > { %p1510_p5 = por %p40_p2, %p39_p0  ;;  %p1514_p6 = por %p46_p4, %p45_p3 }
   0xc   : > { %p237_p7 = scmp.eq.s32.totalorder %s1492_s13, 1  ;;  %p243_p8 = scmp.eq.s32.totalorder %s1066_s14, 1 }
   0xd   : > { %p1187_p10 = scmp.lt.s32.totalorder %s1403_s12, 2  ;;  %s287_s23 = sand.u32 1, %s1399_s11  }
   0xe   : > { %p1521_p11 = por %p237_p7, %p39_p0  ;;  %p1525_p12 = por %p243_p8, %p45_p3 }
   0xf   : > { %s1085_s24 = sshll.u32 %s1403_s12, 10  ;;  %s1069_s25 = sshll.u32 %s287_s23, 6 }
  0x10   : > { %s1972_s21 = scalar_select %p1521_p11, 1, 0 }
  0x11   : > { %s1973_s22 = scalar_select %p1525_p12, 1, 0 }
  0x12   : > { %s1534_s28 = scalar_lea.hbm %s1948_s0, %s1085_s24  ;;  %s291_s29 = scalar_lea.vmem [#allocation3], %s1069_s25 }
  0x13   : > { %s298_s14 = sshll.u32 %s291_s29, 4  ;;  %p1538_p13 = pnand %p1187_p10, %p1510_p5  ;;  %s1542_s14 = int_to_ptr.vmem [resolvable:$true] %s298_s14 }
  0x14   : > { %s1544_s17 = scalar_lea.sflag [#allocation4], %s287_s23  ;;  %s1307_s26 = scalar_lea.hbm %s1534_s28, 1024 }
  0x15   : > { %p1308_p0 = scmp.ne.s32.totalorder %s1534_s28, %s1307_s26  ;;  %p1309_p1 = pneg %p1538_p13 }
  0x16   : > { %s1312_s25 = scalar_lea.hbm %s1948_s0, 2048  ;;  %p1313_p4 = scmp.lt.u32.totalorder %s1534_s28, %s1948_s0 }
  0x17   : > { %p1310_p2 = pnand %p1309_p1, %p1308_p0  ;;  %p1314_p5 = scmp.lt.u32.totalorder %s1312_s25, %s1307_s26 }
  0x18   : > { %p1316_p8 = scmp.lt.u32.totalorder %s1307_s26, %s1534_s28 }
  0x19   : > { %p1311_p3 = pneg %p1310_p2  ;;  %p1315_p7 = por %p1314_p5, %p1313_p4 }
  0x1b   : > { %p1317_p10 = por %p1316_p8, %p1315_p7 }
  0x1d   : > { %p1318_p9 = pnand %p1317_p10, %p1311_p3 }
  0x1f   : > { %1321 = shalt.err (!%p1318_p9)
}
  0x20   : > { %s1322_s23 = scalar_lea.vmem %s1542_s14, 1024  ;;  %s1405_s24 = smov [#allocation3]  }
  0x21   : > { %p1323_p0 = scmp.ne.s32.totalorder %s1542_s14, %s1322_s23  ;;  %s1327_s19 = sshll.u32 %s1405_s24, 4  ;;  %s1328_s19 = int_to_ptr.vmem [resolvable:$false] %s1327_s19 }
  0x22   : > { %s1329_s27 = scalar_lea.vmem %s1328_s19, 2048  ;;  %p1330_p11 = scmp.lt.s32.totalorder %s1542_s14, %s1328_s19 }
  0x23   : > { %p1325_p2 = pnand %p1323_p0, %p1309_p1  ;;  %p1331_p4 = scmp.lt.s32.totalorder %s1329_s27, %s1322_s23 }
  0x25   : > { %p1326_p12 = pneg %p1325_p2  ;;  %p1332_p5 = por %p1331_p4, %p1330_p11 }
  0x27   : > { %p1333_p7 = pnand %p1332_p5, %p1326_p12 }
  0x29   : > { %1336 = shalt.err (!%p1333_p7)
}
  0x2a   : > { %s1406_s26 = smov 256   ;;  %s1407_s25 = smov 16  }
  0x2b   : > { %1182 = dma.hbm_to_vmem [thread:$0]  (!%p1538_p13), %s1534_s28, 1024, %s1542_s14, %s1544_s17, %s1406_s26, %s1406_s26, %s1407_s25  }
  0x2c   : > { %p1072_p9 = scmp.ge.s32.totalorder %s1403_s12, 1  ;;  %p306_p1 = scmp.lt.s32.totalorder %s1403_s12, 3 }
  0x2e   : > { %p307_p3 = pnand %p1072_p9, %p306_p1 }
  0x2f   : > { %s1575_s29 = sand.u32 (!%p307_p3), 1, %s1395_s10  }
  0x30   : > { %310 = sbr.rel (%p307_p3) target bundleno = 1236 (0x4d4), region = 56  ;;  %s1073_s23 = sshll.u32 (!%p307_p3), %s1575_s29, 6 }
  0x31   : > { %s313_s24 = scalar_lea.sflag (!%p307_p3), [#allocation4], %s1575_s29  ;;  %s316_s19 = scalar_lea.vmem (!%p307_p3), [#allocation3], %s1073_s23 }
  0x37   : > { %1382 = dma.done.wait (%p1514_p6), %s313_s24, 1024  }
  0x38   : > { %1384 = vsyncadd (%p1514_p6), %s313_s24, 4294966272  ;;  %v1408_v0 = vmov 0.0   ;;  %v1409_v1 = vmov 0   ;;  %v376_v2 = vld [vmem:[%s316_s19 + $0x8] sm:$0xff]  ;;  %v378_v3 = vld [vmem:[%s316_s19 + $0x18] sm:$0xff]  ;;  %vm389_vm0 = vcmask 261120   ;;  %v351_v23 = vlaneseq }
  0x39   : > { %457 = vmatprep.mubr.f32.mxu0 %v1408_v0  ;;  %1235 = vset.pattern.permute.xlu0 %v1409_v1  ;;  %v375_v4 = vld [vmem:[%s316_s19] sm:$0xff]  ;;  %v1119_v5 = vpack.c.bf16 %v378_v3, %v376_v2  ;;  %v377_v6 = vld [vmem:[%s316_s19 + $0x10] sm:$0xff]  ;;  %v380_v7 = vld [vmem:[%s316_s19 + $0x28] sm:$0xff]  ;;  %s1410_s17 = smov 16   ;;  %s1411_s27 = smov 17  }
  0x3a   : > { %679 = vmatprep.mubr.f32.mxu1 %v1408_v0  ;;  %1306 = vset.pattern.permute.xlu1 %v1409_v1  ;;  %v382_v8 = vld [vmem:[%s316_s19 + $0x38] sm:$0xff]  ;;  %v1121_v9 = vpack.c.bf16 %v377_v6, %v375_v4  ;;  %v379_v11 = vld [vmem:[%s316_s19 + $0x20] sm:$0xff]  ;;  %v381_v12 = vld [vmem:[%s316_s19 + $0x30] sm:$0xff]  ;;  %s1412_s26 = smov 15   ;;  %s1413_s25 = smov 1   ;;  %v1612_v24 = vand.u32 127, %v351_v23 }
  0x3b   : > { %v1123_v10 = vpack.c.bf16 %v382_v8, %v380_v7  ;;  %1120 = vmatprep.subr.bf16.mxu0 %v1119_v5  ;;  %v383_v13 = vld [vmem:[%s1950_s2] sm:$0xff]  ;;  %v1125_v14 = vpack.c.bf16 %v381_v12, %v379_v11  ;;  %s1414_s23 = smov 127   ;;  %s1415_s24 = smov 113  }
  0x3c   : > { %1122 = vmatpush1.bf16.msra.mxu0 %v1121_v9  ;;  %386 = vperm.xlu0 %1235, %v383_v13   ;;  %v374_v15 = vld [vmem:[%s1949_s1] sm:$0xff]  ;;  %s1416_s19 = smov 112   ;;  %s1417_s20 = smov 111   ;;  %v353_v25 = vadd.s32 128, %v1612_v24  ;;  %v354_v28 = vand.u32 15, %v1612_v24  ;;  %v356_v29 = vshra.s32 %v1612_v24, 4 }
  0x3d   : > { %1124 = vmatprep.subr.bf16.mxu0 %v1123_v10  ;;  %v605_v22 = vld [vmem:[%s1952_s4] sm:$0xff]  ;;  %vm1961_vm6 = vcmp.lt.s32.totalorder %v1612_v24, 17  ;;  %vm1962_vm7 = vcmp.lt.s32.totalorder %v1612_v24, 16  ;;  %vm1959_vm13 = vcmp.lt.s32.totalorder %v1612_v24, 15  ;;  %vm1960_vm14 = vcmp.lt.s32.totalorder %v1612_v24, 1  ;;  %s980_s28 = scalar_lea.sflag [#allocation5], %s1575_s29 }
  0x3e   : > { %v355_v26 = vand.u32 15, %v353_v25  ;;  %v357_v27 = vshra.s32 %v353_v25, 4  ;;  %vm1625_vm3 = vcmp.ge.s32.totalorder %v354_v28, 1  ;;  %vm1629_vm4 = vcmp.ge.s32.totalorder %v356_v29, 1  ;;  %v586_v32 = vld [vmem:[%s1951_s3] sm:$0xff]  ;;  %p2026_p11 = scmp.ne.s32.totalorder %s1972_s21, 0 }
  0x3f   : > { %vm366_vm8 = vmand %vm1629_vm4, %vm1625_vm3  ;;  %vm1653_vm11 = vcmp.le.s32.totalorder %v354_v28, 14  ;;  %v770_v12 = vld [vmem:[%s1953_s5] sm:$0xff] }
  0x40   : > { %1126 = vmatpush1.bf16.msra.mxu0 %v1125_v14  ;;  %vm1617_vm1 = vcmp.ge.s32.totalorder %v355_v26, 1  ;;  %vm1621_vm2 = vcmp.ge.s32.totalorder %v357_v27, 1  ;;  %vm1643_vm9 = vcmp.le.s32.totalorder %v355_v26, 14  ;;  %vm1667_vm12 = vmpackc.low %vm1629_vm4, %vm366_vm8  ;;  %vm1706_vm8 = vcmp.le.s32.totalorder %v357_v27, 14  ;;  %v875_v36 = vld [vmem:[%s1956_s8] sm:$0xff] }
  0x41   : > { %vm367_vm5 = vmand %vm1621_vm2, %vm1617_vm1 }
  0x42   : > { %vm1649_vm10 = vmpackc.low %vm1621_vm2, %vm367_vm5 }
  0x43   : > { %1075 = vmatmul.mubr.msk.f32.vlgmr.msra.gmra.mrb[0].mxu0 %vm389_vm0, %v374_v15  ;;  %vm369_vm15 = vmand %vm1621_vm2, %vm1643_vm9 }
  0x44   : > { %862 = vmatprep.mubr.f32.mxu0 %v1408_v0  ;;  %vm368_vm0 = vmand %vm1629_vm4, %vm1653_vm11  ;;  %vm1963_vm4 = vcmp.lt.s32.totalorder %v1612_v24, 127 }
  0x45   : > { %vm1695_vm2 = vmpackc.low %vm1617_vm1, %vm369_vm15  ;;  %vm1418_vm15 = vmmov 1  }
  0x46   : > { %vm1702_vm5 = vmpackc.low %vm1625_vm3, %vm368_vm0  ;;  %vm1718_vm0 = vcmp.le.s32.totalorder %v356_v29, 14 }
  0xbb   : > { %v387_v16 = vpop.permute.xlu0 %386 }
 0x116   : > { %v459_v17 = vpop.f32.mrb[0].mxu0 }
 0x117   : > { %v1592_v18 = vadd.f32 %v459_v17, %v387_v16  ;;  %v461_v19 = vpop.f32.mrb[1].mxu0 }
 0x118   : > { %v1594_v20 = vadd.f32 %v461_v19, %v387_v16 }
 0x11a   : > { %v1241_v21 = vpack.i.bf16 %v1594_v20, %v1592_v18 }
 0x11c   : > { %1242 = vrot.lane.b32.xlu1 %v1241_v21, %s1410_s17  ;;  %1237 = vrot.lane.b32.xlu0 %v1241_v21, %s1411_s27 }
 0x120   : > { %1247 = vrot.lane.b32.xlu1 %v1241_v21, %s1412_s26  ;;  %1252 = vrot.lane.b32.xlu0 %v1241_v21, %s1413_s25 }
 0x124   : > { %1257 = vrot.lane.b32.xlu1 %v1241_v21, %s1414_s23  ;;  %1262 = vrot.lane.b32.xlu0 %v1241_v21, %s1415_s24 }
 0x128   : > { %1267 = vrot.lane.b32.xlu1 %v1241_v21, %s1416_s19  ;;  %571 = vrot.lane.b32.xlu0 %v1592_v18, %s1417_s20 }
 0x12c   : > { %573 = vrot.lane.b32.xlu1 %v1594_v20, %s1417_s20  ;;  %608 = vperm.xlu0 %1235, %v605_v22  }
 0x18e   : > { %v1243_v34 = vpop.permute.xlu1 %1242  ;;  %v1238_v35 = vpop.permute.xlu0 %1237 }
 0x18f   : > { %v1245_v37 = vunpack.i.h.bf16 %v1243_v34  ;;  %v1244_v38 = vunpack.i.l.bf16 %v1243_v34  ;;  %v1240_v39 = vunpack.i.h.bf16 %v1238_v35  ;;  %v1239_v40 = vunpack.i.l.bf16 %v1238_v35 }
 0x191   : > { %v469_v43 = vsel %vm1961_vm6, %v1239_v40, %v1240_v39  ;;  %v484_v44 = vsel %vm1962_vm7, %v1244_v38, %v1245_v37  ;;  %v470_v45 = vsel %vm1961_vm6, %v1240_v39, %v1239_v40  ;;  %v485_v46 = vsel %vm1962_vm7, %v1245_v37, %v1244_v38 }
 0x192   : > { %v1248_v48 = vpop.permute.xlu1 %1247  ;;  %v1253_v49 = vpop.permute.xlu0 %1252  ;;  %v1127_v50 = vpack.c.bf16 %v484_v44, %v469_v43  ;;  %v1130_v51 = vpack.c.bf16 %v485_v46, %v470_v45  ;;  %vm1964_vm6 = vcmp.lt.s32.totalorder %v1612_v24, 113  ;;  %vm1965_vm7 = vcmp.lt.s32.totalorder %v1612_v24, 112  ;;  %v789_v45 = vld [vmem:[%s1954_s6] sm:$0xff]  ;;  %v876_v46 = vld [vmem:[%s1956_s8 + $0x8] sm:$0xff] }
 0x193   : > { %v1250_v52 = vunpack.i.h.bf16 %v1248_v48  ;;  %v1249_v53 = vunpack.i.l.bf16 %v1248_v48  ;;  %v1255_v54 = vunpack.i.h.bf16 %v1253_v49  ;;  %v1254_v55 = vunpack.i.l.bf16 %v1253_v49 }
 0x194   : > { %1129 = vmatprep.subr.msk.bf16.mxu1 %vm1649_vm10, %v1127_v50 }
 0x195   : > { %v499_v56 = vsel %vm1959_vm13, %v1249_v53, %v1250_v52  ;;  %v500_v57 = vsel %vm1959_vm13, %v1250_v52, %v1249_v53  ;;  %v514_v58 = vsel %vm1960_vm14, %v1254_v55, %v1255_v54  ;;  %v515_v59 = vsel %vm1960_vm14, %v1255_v54, %v1254_v55  ;;  %1132 = vmatpush1.bf16.msk.msra.mxu1 %vm1667_vm12, %v1130_v51  ;;  %vm1714_vm13 = vmpackc.low %vm1643_vm9, %vm1418_vm15 }
 0x196   : > { %v1133_v61 = vpack.c.bf16 %v514_v58, %v499_v56  ;;  %v1136_v62 = vpack.c.bf16 %v515_v59, %v500_v57  ;;  %v1258_v63 = vpop.permute.xlu1 %1257  ;;  %v1263_v1 = vpop.permute.xlu0 %1262  ;;  %vm1730_vm14 = vmpackc.low %vm1653_vm11, %vm1418_vm15 }
 0x197   : > { %v1260_v3 = vunpack.i.h.bf16 %v1258_v63  ;;  %v1259_v4 = vunpack.i.l.bf16 %v1258_v63  ;;  %v1265_v10 = vunpack.i.h.bf16 %v1263_v1  ;;  %v1264_v11 = vunpack.i.l.bf16 %v1263_v1  ;;  %vm370_vm15 = vmand %vm1718_vm0, %vm1625_vm3 }
 0x198   : > { %1135 = vmatprep.subr.msk.bf16.mxu1 %vm1695_vm2, %v1133_v61  ;;  %vm1969_vm3 = vcmp.lt.s32.totalorder %v1612_v24, 111 }
 0x199   : > { %v531_v8 = vsel %vm1963_vm4, %v1259_v4, %v1260_v3  ;;  %v532_v9 = vsel %vm1963_vm4, %v1260_v3, %v1259_v4  ;;  %1138 = vmatpush1.bf16.msk.msra.mxu1 %vm1702_vm5, %v1136_v62  ;;  %vm371_vm4 = vmand %vm1706_vm8, %vm1617_vm1  ;;  %v546_v19 = vsel %vm1964_vm6, %v1264_v11, %v1265_v10  ;;  %v547_v21 = vsel %vm1964_vm6, %v1265_v10, %v1264_v11 }
 0x19a   : > { %v1139_v13 = vpack.c.bf16 %v532_v9, %v1594_v20  ;;  %v1142_v14 = vpack.c.bf16 %v531_v8, %v1592_v18  ;;  %v1268_v15 = vpop.permute.xlu1 %1267  ;;  %vm1760_vm1 = vmpackc.low %vm1706_vm8, %vm371_vm4  ;;  %v572_v30 = vpop.permute.xlu0 %571 }
 0x19b   : > { %v1270_v16 = vunpack.i.h.bf16 %v1268_v15  ;;  %v1269_v17 = vunpack.i.l.bf16 %v1268_v15  ;;  %vm1767_vm6 = vmpackc.low %vm1718_vm0, %vm370_vm15  ;;  %vm1966_vm15 = vcmask 588800  }
 0x19c   : > { %1141 = vmatprep.subr.msk.bf16.mxu1 %vm1714_vm13, %v1139_v13  ;;  %vm1967_vm4 = vmand %vm1718_vm0, %vm1653_vm11 }
 0x19d   : > { %v561_v22 = vsel %vm1965_vm7, %v1269_v17, %v1270_v16  ;;  %v562_v23 = vsel %vm1965_vm7, %v1270_v16, %v1269_v17  ;;  %1144 = vmatpush1.bf16.msk.msra.mxu1 %vm1730_vm14, %v1142_v14  ;;  %vm1968_vm7 = vmand %vm1706_vm8, %vm1643_vm9 }
 0x19e   : > { %v1145_v26 = vpack.c.bf16 %v562_v23, %v547_v21  ;;  %v1148_v27 = vpack.c.bf16 %v561_v22, %v546_v19  ;;  %v574_v28 = vpop.permute.xlu1 %573 }
 0x19f   : > { %v577_v31 = vsel %vm1969_vm3, %v574_v28, %v572_v30  ;;  %v576_v33 = vsel %vm1969_vm3, %v572_v30, %v574_v28 }
 0x1a0   : > { %1147 = vmatprep.subr.msk.bf16.mxu1 %vm1760_vm1, %v1145_v26 }
 0x1a1   : > { %1150 = vmatpush1.bf16.msk.msra.mxu1 %vm1767_vm6, %v1148_v27 }
 0x1a2   : > { %1101 = vmatprep.subr.msk.mxu1 %vm1968_vm7, %v577_v31  ;;  %vm2009_vm7 = vcmp.lt.s32.totalorder %v1612_v24, 17 }
 0x1a3   : > { %vm2010_vm3 = vmmov %vm2009_vm7 }
 0x1a5   : > { %1102 = vmatpush1.msk.msra.mxu1 %vm1967_vm4, %v576_v33 }
 0x1a6   : > { %1076 = vmatmul.mubr.msk.f32.vlgmr.msra.gmra.mrb[0].mxu1 %vm1966_vm15, %v586_v32  ;;  %vm2007_vm15 = vcmp.lt.s32.totalorder %v1612_v24, 16 }
 0x1a7   : > { %958 = vmatprep.mubr.f32.mxu1 %v1408_v0  ;;  %vm2008_vm4 = vmmov %vm2007_vm15 }
 0x1ab   : > { %v609_v34 = vpop.permute.xlu0 %608 }
 0x279   : > { %v681_v35 = vpop.f32.mrb[0].mxu1 }
 0x27a   : > { %v682_v37 = vadd.f32 %v681_v35, %v609_v34  ;;  %v683_v38 = vpop.f32.mrb[1].mxu1 }
 0x27b   : > { %v684_v39 = vadd.f32 %v683_v38, %v609_v34 }
 0x27c   : > { %v1802_v40 = vmax.f32 %v682_v37, 0.0 }
 0x27d   : > { %v687_v43 = vmax.f32 %v684_v39, 0.0 }
 0x27f   : > { %v1276_v44 = vpack.i.bf16 %v687_v43, %v1802_v40 }
 0x281   : > { %1277 = vrot.lane.b32.xlu0 %v1276_v44, %s1410_s17  ;;  %1272 = vrot.lane.b32.xlu1 %v1276_v44, %s1411_s27  ;;  %s1074_s27 = sshll.u32 %s1575_s29, 5 }
 0x285   : > { %1287 = vrot.lane.b32.xlu0 %v1276_v44, %s1413_s25  ;;  %1282 = vrot.lane.b32.xlu1 %v1276_v44, %s1412_s26  ;;  %s350_s25 = scalar_lea.vmem [#allocation6], %s1074_s27 }
 0x286   : > { %s993_s26 = sshll.u32 %s350_s25, 4  ;;  %s1898_s26 = int_to_ptr.vmem [resolvable:$true] %s993_s26 }
 0x287   : > { %s1337_s14 = scalar_lea.vmem %s1898_s26, 512 }
 0x288   : > { %p1338_p6 = scmp.ne.s32.totalorder %s1898_s26, %s1337_s14 }
 0x289   : > { %1297 = vrot.lane.b32.xlu0 %v1276_v44, %s1415_s24  ;;  %1292 = vrot.lane.b32.xlu1 %v1276_v44, %s1414_s23  ;;  %s1086_s23 = sshll.u32 %s1492_s13, 9  ;;  %s1419_s13 = smov [#allocation6]  }
 0x28a   : > { %p1339_p12 = pnand %p1338_p6, %p2026_p11  ;;  %s1341_s16 = sshll.u32 %s1419_s13, 4  ;;  %s1342_s16 = int_to_ptr.vmem [resolvable:$false] %s1341_s16 }
 0x28b   : > { %s1343_s27 = scalar_lea.vmem %s1342_s16, 1024  ;;  %p1344_p8 = scmp.lt.s32.totalorder %s1898_s26, %s1342_s16 }
 0x28c   : > { %p1340_p13 = pneg %p1339_p12  ;;  %p1345_p10 = scmp.lt.s32.totalorder %s1343_s27, %s1337_s14 }
 0x28d   : > { %760 = vrot.lane.b32.xlu0 %v1802_v40, %s1417_s20  ;;  %1302 = vrot.lane.b32.xlu1 %v1276_v44, %s1416_s19  ;;  %v871_v44 = vld [vmem:[%s1955_s7] sm:$0xff] }
 0x28e   : > { %p1346_p0 = por %p1345_p10, %p1344_p8 }
 0x290   : > { %p1347_p2 = pnand %p1346_p0, %p1340_p13 }
 0x291   : > { %792 = vperm.xlu0 %1235, %v789_v45   ;;  %762 = vrot.lane.b32.xlu1 %v687_v43, %s1417_s20  ;;  %v872_v45 = vld [vmem:[%s1955_s7 + $0x8] sm:$0xff]  ;;  %s1903_s20 = scalar_lea.hbm %s1957_s9, %s1086_s23 }
 0x295   : > { %884 = vperm.xlu0 %1235, %v876_v46   ;;  %879 = vperm.xlu1 %1306, %v875_v36  }
 0x2f3   : > { %v1278_v48 = vpop.permute.xlu0 %1277  ;;  %v1273_v49 = vpop.permute.xlu1 %1272 }
 0x2f4   : > { %v1280_v50 = vunpack.i.h.bf16 %v1278_v48  ;;  %v1279_v51 = vunpack.i.l.bf16 %v1278_v48  ;;  %v1275_v52 = vunpack.i.h.bf16 %v1273_v49  ;;  %v1274_v53 = vunpack.i.l.bf16 %v1273_v49 }
 0x2f6   : > { %v702_v54 = vsel %vm2007_vm15, %v1279_v51, %v1280_v50  ;;  %v703_v55 = vsel %vm2008_vm4, %v1280_v50, %v1279_v51  ;;  %v692_v56 = vsel %vm2009_vm7, %v1274_v53, %v1275_v52  ;;  %v693_v57 = vsel %vm2010_vm3, %v1275_v52, %v1274_v53 }
 0x2f7   : > { %v1151_v58 = vpack.c.bf16 %v702_v54, %v692_v56  ;;  %v1154_v59 = vpack.c.bf16 %v703_v55, %v693_v57  ;;  %v1288_v61 = vpop.permute.xlu0 %1287  ;;  %v1283_v62 = vpop.permute.xlu1 %1282  ;;  %vm2011_vm15 = vcmp.lt.s32.totalorder %v1612_v24, 1  ;;  %vm2013_vm7 = vcmp.lt.s32.totalorder %v1612_v24, 15 }
 0x2f8   : > { %v1290_v63 = vunpack.i.h.bf16 %v1288_v61  ;;  %v1289_v1 = vunpack.i.l.bf16 %v1288_v61  ;;  %v1285_v3 = vunpack.i.h.bf16 %v1283_v62  ;;  %v1284_v4 = vunpack.i.l.bf16 %v1283_v62  ;;  %vm2012_vm4 = vmmov %vm2011_vm15 }
 0x2f9   : > { %1153 = vmatprep.subr.msk.bf16.mxu0 %vm1649_vm10, %v1151_v58  ;;  %vm2014_vm3 = vmmov %vm2013_vm7  ;;  %vm2015_vm10 = vcmp.lt.s32.totalorder %v1612_v24, 127 }
 0x2fa   : > { %v722_v8 = vsel %vm2011_vm15, %v1289_v1, %v1290_v63  ;;  %v723_v9 = vsel %vm2012_vm4, %v1290_v63, %v1289_v1  ;;  %v712_v10 = vsel %vm2013_vm7, %v1284_v4, %v1285_v3  ;;  %v713_v11 = vsel %vm2014_vm3, %v1285_v3, %v1284_v4  ;;  %1156 = vmatpush1.bf16.msk.msra.mxu0 %vm1667_vm12, %v1154_v59  ;;  %vm2016_vm15 = vmmov %vm2015_vm10 }
 0x2fb   : > { %v1157_v13 = vpack.c.bf16 %v722_v8, %v712_v10  ;;  %v1160_v14 = vpack.c.bf16 %v723_v9, %v713_v11  ;;  %v1298_v15 = vpop.permute.xlu0 %1297  ;;  %v1293_v41 = vpop.permute.xlu1 %1292  ;;  %vm2017_vm12 = vcmp.lt.s32.totalorder %v1612_v24, 113  ;;  %vm2019_vm4 = vcmp.lt.s32.totalorder %v1612_v24, 112  ;;  %vm2022_vm7 = vmand %vm1706_vm8, %vm1643_vm9 }
 0x2fc   : > { %v1295_v16 = vunpack.i.h.bf16 %v1293_v41  ;;  %v1294_v17 = vunpack.i.l.bf16 %v1293_v41  ;;  %v1300_v19 = vunpack.i.h.bf16 %v1298_v15  ;;  %v1299_v21 = vunpack.i.l.bf16 %v1298_v15 }
 0x2fd   : > { %1159 = vmatprep.subr.msk.bf16.mxu0 %vm1695_vm2, %v1157_v13  ;;  %vm2018_vm2 = vmmov %vm2017_vm12  ;;  %vm887_vm9 = vcmask 64512  }
 0x2fe   : > { %v734_v22 = vsel %vm2015_vm10, %v1294_v17, %v1295_v16  ;;  %v735_v23 = vsel %vm2016_vm15, %v1295_v16, %v1294_v17  ;;  %1162 = vmatpush1.bf16.msk.msra.mxu0 %vm1702_vm5, %v1160_v14  ;;  %v744_v60 = vsel %vm2017_vm12, %v1299_v21, %v1300_v19  ;;  %v745_v31 = vsel %vm2018_vm2, %v1300_v19, %v1299_v21  ;;  %vm2020_vm5 = vmmov %vm2019_vm4 }
 0x2ff   : > { %v1163_v47 = vpack.c.bf16 %v735_v23, %v687_v43  ;;  %v1166_v26 = vpack.c.bf16 %v734_v22, %v1802_v40  ;;  %v1303_v27 = vpop.permute.xlu1 %1302  ;;  %v761_v6 = vpop.permute.xlu0 %760 }
 0x300   : > { %v1305_v28 = vunpack.i.h.bf16 %v1303_v27  ;;  %v1304_v30 = vunpack.i.l.bf16 %v1303_v27 }
 0x301   : > { %1165 = vmatprep.subr.msk.bf16.mxu0 %vm1714_vm13, %v1163_v47  ;;  %vm2021_vm13 = vcmp.lt.s32.totalorder %v1612_v24, 111 }
 0x302   : > { %v754_v32 = vsel %vm2019_vm4, %v1304_v30, %v1305_v28  ;;  %v755_v2 = vsel %vm2020_vm5, %v1305_v28, %v1304_v30  ;;  %1168 = vmatpush1.bf16.msk.msra.mxu0 %vm1730_vm14, %v1166_v26  ;;  %vm2023_vm14 = vmmov %vm2021_vm13 }
 0x303   : > { %v1169_v33 = vpack.c.bf16 %v755_v2, %v745_v31  ;;  %v1172_v34 = vpack.c.bf16 %v754_v32, %v744_v60  ;;  %v763_v35 = vpop.permute.xlu1 %762 }
 0x304   : > { %v765_v37 = vsel %vm2021_vm13, %v763_v35, %v761_v6  ;;  %v764_v25 = vsel %vm2023_vm14, %v761_v6, %v763_v35 }
 0x305   : > { %1171 = vmatprep.subr.msk.bf16.mxu0 %vm1760_vm1, %v1169_v33  ;;  %vm2024_vm1 = vmand %vm1718_vm0, %vm1653_vm11 }
 0x306   : > { %1174 = vmatpush1.bf16.msk.msra.mxu0 %vm1767_vm6, %v1172_v34  ;;  %vm2025_vm6 = vcmask 588800  }
 0x307   : > { %1117 = vmatprep.subr.msk.mxu0 %vm2022_vm7, %v765_v37 }
 0x30a   : > { %1118 = vmatpush1.msk.msra.mxu0 %vm2024_vm1, %v764_v25 }
 0x30b   : > { %1077 = vmatmul.mubr.msk.f32.vlgmr.msra.gmra.mrb[2].mxu0 %vm2025_vm6, %v770_v12 }
 0x310   : > { %v793_v5 = vpop.permute.xlu0 %792 }
 0x314   : > { %v880_v46 = vpop.permute.xlu1 %879  ;;  %v885_v51 = vpop.permute.xlu0 %884 }
 0x3de   : > { %v864_v29 = vpop.f32.mrb[2].mxu0 }
 0x3df   : > { %v865_v38 = vadd.f32 %v864_v29, %v793_v5  ;;  %v866_v39 = vpop.f32.mrb[3].mxu0 }
 0x3e0   : > { %v867_v24 = vadd.f32 %v866_v39, %v793_v5 }
 0x3e1   : > { %v869_v40 = vmax.f32 %v865_v38, 0.0 }
 0x3e2   : > { %v870_v43 = vmax.f32 %v867_v24, 0.0 }
 0x3e3   : > { %v873_v42 = vadd.f32 %v869_v40, %v1592_v18 }
 0x3e4   : > { %v874_v7 = vadd.f32 %v870_v43, %v1594_v20 }
 0x3e6   : > { %894 = vmatprep.subr.mxu1 %v874_v7 }
 0x3e7   : > { %895 = vmatpush1.msra.mxu1 %v873_v42 }
 0x3e8   : > { %1078 = vmatmul.mubr.msk.f32.vlgmr.msra.gmra.mrb[2].mxu1 %vm887_vm9, %v871_v44 }
 0x3e9   : > { %964 = vmatprep.mubr.f32.mxu1 %v1408_v0 }
 0x3ec   : > { %1079 = vmatmul.mubr.msk.f32.gmra.mrb[4].mxu1 %vm887_vm9, %v872_v45 }
 0x4bb   : > { %v960_v20 = vpop.f32.mrb[2].mxu1 }
 0x4bc   : > { %v961_v18 = vadd.f32 %v960_v20, %v880_v46  ;;  %v962_v48 = vpop.f32.mrb[3].mxu1 }
 0x4bd   : > { %v963_v49 = vadd.f32 %v962_v48, %v880_v46 }
 0x4be   : > { %v971_v50 = vmax.f32 %v961_v18, 0.0 }
 0x4bf   : > { %v972_v52 = vmax.f32 %v963_v49, 0.0  ;;  %v966_v53 = vpop.f32.mrb[4].mxu1 }
 0x4c0   : > { %975 = vst [vmem:[%s350_s25] sm:$0xff] %v971_v50  ;;  %v967_v0 = vadd.f32 %v966_v53, %v885_v51  ;;  %v968_v54 = vpop.f32.mrb[5].mxu1 }
 0x4c1   : > { %976 = vst [vmem:[%s350_s25 + $0x8] sm:$0xff] %v972_v52  ;;  %v969_v55 = vadd.f32 %v968_v54, %v885_v51 }
 0x4c2   : > { %v973_v56 = vmax.f32 %v967_v0, 0.0 }
 0x4c3   : > { %v974_v57 = vmax.f32 %v969_v55, 0.0 }
 0x4c4   : > { %977 = vst [vmem:[%s350_s25 + $0x10] sm:$0xff] %v973_v56 }
 0x4c5   : > { %978 = vst [vmem:[%s350_s25 + $0x18] sm:$0xff] %v974_v57 }
 0x4c6   : > { %1350 = shalt.err (!%p1347_p2)
}
 0x4c7   : > { %s1351_s25 = scalar_lea.hbm %s1903_s20, 512  ;;  %s1355_s19 = scalar_lea.hbm %s1957_s9, 1024 }
 0x4c8   : > { %p1352_p4 = scmp.ne.s32.totalorder %s1903_s20, %s1351_s25  ;;  %p1356_p9 = scmp.lt.u32.totalorder %s1903_s20, %s1957_s9 }
 0x4c9   : > { %p1357_p1 = scmp.lt.u32.totalorder %s1355_s19, %s1351_s25  ;;  %p1359_p6 = scmp.lt.u32.totalorder %s1351_s25, %s1903_s20 }
 0x4ca   : > { %p1353_p5 = pnand %p1352_p4, %p2026_p11 }
 0x4cb   : > { %p1358_p3 = por %p1357_p1, %p1356_p9 }
 0x4cc   : > { %p1354_p7 = pneg %p1353_p5 }
 0x4cd   : > { %p1360_p12 = por %p1359_p6, %p1358_p3 }
 0x4cf   : > { %p1361_p13 = pnand %p1360_p12, %p1354_p7 }
 0x4d1   : > { %1364 = shalt.err (!%p1361_p13)
}
 0x4d2   : > { %s1420_s14 = smov 256  }
 0x4d3   : > { %1177 = dma.vmem_to_hbm [thread:$0]  (%p2026_p11), %s1898_s26, 512, %s1903_s20, %s980_s28, %s1420_s14, %s1420_s14, %s1410_s17  }
 0x4d4 PF: > { %s1008_s27 = sand.u32 1, %s1391_s30   ;;  %p2027_p8 = scmp.ne.s32.totalorder %s1973_s22, 0 }
 0x4d5   : > { %p2028_p10 = scmp.ge.s32.totalorder %s1403_s12, 2  ;;  %s1009_s25 = scalar_lea.sflag [#allocation5], %s1008_s27 }
 0x4d7   : > { %p1184_p0 = pnand %p2028_p10, %p2027_p8 }
 0x4d9   : > { %1386 = dma.done.wait (!%p1184_p0), %s1009_s25, 512  }
 0x4da   : > { %1388 = vsyncadd (!%p1184_p0), %s1009_s25, 4294966784  ;;  %p22_p2 = scmp.ge.s32.totalorder %s1496_s15, 4   ;;  %s2029_s30 = smov %s1395_s10 }
 0x4db   : > { %s2030_s10 = smov %s1399_s11  ;;  %s2031_s11 = smov %s1508_s18 }
 0x4dc   : > { %s2032_s12 = smov %s1496_s15  ;;  %24 = sbr.rel (!%p22_p2) target bundleno = 5 (0x5), region = 101 }
 0x4e3   :  { %1014 = vsyncpa [#allocation4], 1 }
 0x4e4   :  { %1016 = vsyncpa [#allocation4 + $0x1], 1 }
 0x4e5   :  { %1017 = vsyncpa [#allocation5], 1 }
 0x4e6   :  { %1019 = vsyncpa [#allocation5 + $0x1], 1 }

</bundles_post_ra>
